<compile_context>
chip_gen: v5e
topology: v5e:2x2
jax: 0.10.0
libtpu: 0.0.40
codegen_flags: <defaults>
</compile_context>

<pallas_src>
import functools

import jax
import jax.numpy as jnp
from jax import lax
from jax.experimental import pallas as pl
from jax.experimental.pallas import tpu as pltpu


def _round_up(x, m):
    return ((x + m - 1) // m) * m


def _alpha_loss_kernel(values_ref, y_policy_ref, policy_ref, out_ref, *,
                       batch, block_rows):
    i = pl.program_id(0)

    # (tb, A) policy tiles; upcast to f32 for log/multiply (mandatory on v5e).
    yp = y_policy_ref[...].astype(jnp.float32)
    p = policy_ref[...].astype(jnp.float32)

    # Ragged-last-tile row mask (replaces wrapper-side padding).  Out-of-bounds
    # rows may contain garbage (even NaN after the log); jnp.where discards them.
    row = i * block_rows + lax.broadcasted_iota(jnp.int32, (block_rows, 1), 0)
    mask = row < batch

    ce = jnp.where(mask, p * jnp.log(jnp.float32(1e-8) + yp), jnp.float32(0.0))
    partial = -jnp.sum(ce)                       # per-tile cross-entropy partial

    # Value squared-error term: values_ref is the full (2, B) array, resident
    # across the grid (loaded once).  Folded into the first tile's partial only.
    v = values_ref[...].astype(jnp.float32)
    vdiff = v[1:2, :] - v[0:1, :]
    v_term = jnp.sum(vdiff * vdiff)
    partial = partial + jnp.where(i == 0, v_term, jnp.float32(0.0))

    # Each grid step owns its own output block => safe under "parallel"
    # (v7x 2-TC split); the wrapper sums the partials and scales by 1/B.
    out_ref[...] = jnp.broadcast_to(partial, out_ref.shape).astype(jnp.float32)


def alpha_loss(y_value, value, y_policy, policy, *, block_rows=None,
               target_tile_bytes=8 << 20):
    B, A = y_policy.shape
    assert policy.shape == (B, A)
    Ap = _round_up(A, 128)                         # lane-padded VMEM footprint
    itemsize = max(jnp.dtype(y_policy.dtype).itemsize,
                   jnp.dtype(policy.dtype).itemsize)

    # Rows per batch tile: multiple of 16 (covers f32 and bf16 sublane tiling),
    # sized so each double-buffered policy tile is ~target_tile_bytes.
    if block_rows is None:
        tb = target_tile_bytes // (Ap * itemsize)
    else:
        tb = block_rows
    tb = max(16, min(int(tb), 8192))
    tb = _round_up(tb, 16)
    tb = min(tb, _round_up(B, 16))                 # small B -> single (ragged) tile
    num_tiles = pl.cdiv(B, tb)

    # Tiny value streams consolidated into one resident (2, B) block.
    values = jnp.stack([jnp.reshape(y_value, (-1,)).astype(jnp.float32),
                        jnp.reshape(value, (-1,)).astype(jnp.float32)], axis=0)

    kernel = functools.partial(_alpha_loss_kernel, batch=B, block_rows=tb)

    partials = pl.pallas_call(
        kernel,
        out_shape=jax.ShapeDtypeStruct((num_tiles, 8, 128), jnp.float32),
        grid_spec=pltpu.PrefetchScalarGridSpec(
            num_scalar_prefetch=0,
            grid=(num_tiles,),
            in_specs=[
                pl.BlockSpec((2, B), lambda i: (0, 0)),     # y_value / value (resident)
                pl.BlockSpec((tb, A), lambda i: (i, 0)),    # y_policy
                pl.BlockSpec((tb, A), lambda i: (i, 0)),    # policy
            ],
            out_specs=pl.BlockSpec((1, 8, 128), lambda i: (i, 0, 0)),
        ),
        compiler_params=pltpu.CompilerParams(
            dimension_semantics=("parallel",),
            vmem_limit_bytes=48 * 1024 * 1024,
        ),
    )(values, y_policy, policy)

    return jnp.sum(partials[:, 0, 0]) * jnp.float32(1.0 / B)


def alpha_loss_ref(y_value, value, y_policy, policy):
    value_error = (value.astype(jnp.float32) - y_value.astype(jnp.float32)) ** 2
    policy_error = jnp.sum(-policy * jnp.log(1e-8 + y_policy.astype(jnp.float32)),
                           axis=1)
    return jnp.mean(value_error.reshape(-1) + policy_error)


if __name__ == "__main__":
    key = jax.random.PRNGKey(0)

    def make_inputs(k, B, A, policy_dtype=jnp.float32):
        k1, k2, k3, k4 = jax.random.split(k, 4)
        y_value = jax.random.uniform(k1, (B, 1), jnp.float32, minval=-1.0, maxval=1.0)
        value = jax.random.uniform(k2, (B, 1), jnp.float32, minval=-1.0, maxval=1.0)
        y_policy = jax.nn.softmax(jax.random.normal(k3, (B, A), jnp.float32), -1)
        policy = jax.nn.softmax(jax.random.normal(k4, (B, A), jnp.float32), -1)
        return (y_value, value,
                y_policy.astype(policy_dtype), policy.astype(policy_dtype))

    cases = [
        (8, 128, None, jnp.float32),    # small, single ragged tile
        (20, 70, None, jnp.float32),    # unaligned B and A (full-extent lane dim)
        (96, 128, 32, jnp.float32),     # multiple grid steps -> partials summed
        (24, 128, None, jnp.bfloat16),  # bf16 policy streams pass straight through
    ]
    keys = jax.random.split(key, len(cases))
    for k, (B, A, br, pdt) in zip(keys, cases):
        args = make_inputs(k, B, A, pdt)
        out = jax.block_until_ready(alpha_loss(*args, block_rows=br))
        ref = jax.block_until_ready(alpha_loss_ref(*args))
        assert jnp.allclose(out, ref, rtol=1e-4, atol=1e-5), (B, A, float(out), float(ref))

    print("KERNEL_OK")
</pallas_src>

<mosaic_0001>
module attributes {stable_mosaic.version = 11 : i64} {
  func.func @_alpha_loss_kernel(%arg0: i32, %arg1: memref<2x8xf32, #tpu.memory_space<vmem>>, %arg2: memref<16x128xf32, #tpu.memory_space<vmem>>, %arg3: memref<16x128xf32, #tpu.memory_space<vmem>>, %arg4: memref<1x8x128xf32, #tpu.memory_space<vmem>>) attributes {dimension_semantics = [#tpu.dimension_semantics<parallel>], iteration_bounds = array<i64: 1>, scalar_prefetch = 0 : i64, scratch_operands = 0 : i64, tpu.core_type = #tpu.core_type<tc>, window_params = [{pipeline_mode = #tpu.pipeline_mode<synchronous>, transform_indices = @transform_0, window_bounds = array<i64: 2, 8>}, {transform_indices = @transform_1, window_bounds = array<i64: 16, 128>}, {transform_indices = @transform_2, window_bounds = array<i64: 16, 128>}, {transform_indices = @transform_3, window_bounds = array<i64: 1, 8, 128>}]} {
    %c0 = arith.constant 0 : index
    %c0_0 = arith.constant 0 : index
    %0 = vector.load %arg2[%c0, %c0_0] : memref<16x128xf32, #tpu.memory_space<vmem>>, vector<16x128xf32>
    %c0_1 = arith.constant 0 : index
    %c0_2 = arith.constant 0 : index
    %1 = vector.load %arg3[%c0_1, %c0_2] : memref<16x128xf32, #tpu.memory_space<vmem>>, vector<16x128xf32>
    %c16_i32 = arith.constant 16 : i32
    %2 = arith.muli %arg0, %c16_i32 : i32
    %3 = tpu.iota {dimensions = array<i32: 0>} : vector<16x1xi32>
    %4 = vector.broadcast %2 : i32 to vector<16x1xi32>
    %5 = arith.addi %4, %3 : vector<16x1xi32>
    %c8_i32 = arith.constant 8 : i32
    %6 = vector.broadcast %c8_i32 : i32 to vector<16x1xi32>
    %7 = arith.cmpi slt, %5, %6 : vector<16x1xi32>
    %cst = arith.constant 9.99999993E-9 : f32
    %8 = vector.broadcast %cst : f32 to vector<16x128xf32>
    %9 = arith.addf %8, %0 : vector<16x128xf32>
    %10 = math.log %9 : vector<16x128xf32>
    %11 = arith.mulf %1, %10 : vector<16x128xf32>
    %cst_3 = arith.constant 0.000000e+00 : f32
    %12 = vector.shape_cast %7 : vector<16x1xi1> to vector<16x1xi1>
    %13 = vector.broadcast %12 : vector<16x1xi1> to vector<16x128xi1>
    %14 = vector.broadcast %cst_3 : f32 to vector<16x128xf32>
    %15 = arith.select %13, %11, %14 : vector<16x128xi1>, vector<16x128xf32>
    %16 = vector.shape_cast %15 : vector<16x128xf32> to vector<1x16x128xf32>
    %cst_4 = arith.constant dense<0.000000e+00> : vector<1xf32>
    %17 = vector.multi_reduction <add>, %16, %cst_4 [1, 2] : vector<1x16x128xf32> to vector<1xf32>
    %18 = vector.shape_cast %17 : vector<1xf32> to vector<1x1x1xf32>
    %19 = vector.extract %18[0, 0, 0] : f32 from vector<1x1x1xf32>
    %cst_5 = arith.constant 0.000000e+00 : f32
    %20 = arith.subf %cst_5, %19 : f32
    %c0_6 = arith.constant 0 : index
    %c0_7 = arith.constant 0 : index
    %21 = vector.load %arg1[%c0_6, %c0_7] : memref<2x8xf32, #tpu.memory_space<vmem>>, vector<2x8xf32>
    %22 = vector.extract_strided_slice %21 {offsets = [1, 0], sizes = [1, 8], strides = [1, 1]} : vector<2x8xf32> to vector<1x8xf32>
    %23 = vector.extract_strided_slice %21 {offsets = [0, 0], sizes = [1, 8], strides = [1, 1]} : vector<2x8xf32> to vector<1x8xf32>
    %24 = arith.subf %22, %23 : vector<1x8xf32>
    %25 = arith.mulf %24, %24 : vector<1x8xf32>
    %26 = vector.shape_cast %25 : vector<1x8xf32> to vector<1x1x8xf32>
    %cst_8 = arith.constant dense<0.000000e+00> : vector<1xf32>
    %27 = vector.multi_reduction <add>, %26, %cst_8 [1, 2] : vector<1x1x8xf32> to vector<1xf32>
    %28 = vector.shape_cast %27 : vector<1xf32> to vector<1x1x1xf32>
    %29 = vector.extract %28[0, 0, 0] : f32 from vector<1x1x1xf32>
    %c0_i32 = arith.constant 0 : i32
    %30 = arith.cmpi eq, %arg0, %c0_i32 : i32
    %cst_9 = arith.constant 0.000000e+00 : f32
    %31 = arith.select %30, %29, %cst_9 : f32
    %32 = arith.addf %20, %31 : f32
    %33 = vector.broadcast %32 : f32 to vector<1x8x128xf32>
    %c0_10 = arith.constant 0 : index
    %c0_11 = arith.constant 0 : index
    %c0_12 = arith.constant 0 : index
    %34 = vector.load %arg4[%c0_10, %c0_11, %c0_12] : memref<1x8x128xf32, #tpu.memory_space<vmem>>, vector<1x8x128xf32>
    tpu.vector_store %arg4[%c0_10, %c0_11, %c0_12], %33 {strides = array<i32>} : memref<1x8x128xf32, #tpu.memory_space<vmem>>, vector<1x8x128xf32>,
    return
  }
  func.func @transform_0(%arg0: i32) -> (i32, i32) {
    %c0_i32 = arith.constant 0 : i32
    %c0_i32_0 = arith.constant 0 : i32
    %c0_i32_1 = arith.constant 0 : i32
    return %c0_i32, %c0_i32_0 : i32, i32
  }
  func.func @transform_1(%arg0: i32) -> (i32, i32) {
    %c0_i32 = arith.constant 0 : i32
    %c0_i32_0 = arith.constant 0 : i32
    return %arg0, %c0_i32 : i32, i32
  }
  func.func @transform_2(%arg0: i32) -> (i32, i32) {
    %c0_i32 = arith.constant 0 : i32
    %c0_i32_0 = arith.constant 0 : i32
    return %arg0, %c0_i32 : i32, i32
  }
  func.func @transform_3(%arg0: i32) -> (i32, i32, i32) {
    %c0_i32 = arith.constant 0 : i32
    %c0_i32_0 = arith.constant 0 : i32
    %c0_i32_1 = arith.constant 0 : i32
    return %arg0, %c0_i32, %c0_i32_0 : i32, i32, i32
  }
}

</mosaic_0001>

<bundles_post_ra>
// kernel: tpu_custom_call.1
= control target key start
LH: loop header
LB: loop body
LE: loop exit
PB: predicated region body
PF: predicated region fallthrough
CT: control target
= control target key end

     0   :  { %8 = vsyncpa [#allocation3], 0  ;;  %s293_s0 = inlined_call_operand.hbm [shape: f32[2,8], index: 0, kind: input, shape index: {}]   ;;  %s294_s1 = inlined_call_operand.hbm [shape: f32[8,128], index: 1, kind: input, shape index: {}]   ;;  %s295_s2 = inlined_call_operand.hbm [shape: f32[8,128], index: 2, kind: input, shape index: {}]   ;;  %s296_s3 = inlined_call_operand.hbm [shape: f32[1,8,128], index: 3, kind: output, shape index: {}]  }
   0x1   :  { %9 = vsyncpa [#allocation6], 0 }
   0x2   :  { %10 = vsyncpa [#allocation4], 0  ;;  %s16_s14 = sshll.u32 %s293_s0, 4  ;;  %s255_s15 = smov [#allocation2]   ;;  %s17_s14 = int_to_ptr.hbm [resolvable:$true] %s16_s14 }
   0x3   :  { %s18_s16 = sshll.u32 %s255_s15, 4  ;;  %s19_s16 = int_to_ptr.vmem [resolvable:$true] %s18_s16 }
   0x4   :  { %21 = dma.hbm_to_vmem [thread:$0]  %s17_s14, 32, %s19_s16, [#allocation3]  }
   0x5   :  { %25 = vsyncadd [#allocation6], 128  ;;  %s26_s19 = sshll.u32 %s294_s1, 4  ;;  %s256_s20 = smov [#allocation5]   ;;  %s27_s19 = int_to_ptr.hbm [resolvable:$true] %s26_s19 }
   0x6   :  { %s28_s21 = sshll.u32 %s256_s20, 4  ;;  %s257_s22 = smov 128   ;;  %s29_s21 = int_to_ptr.vmem [resolvable:$true] %s28_s21 }
   0x7   :  { %s258_s23 = smov 8  }
   0x8   :  { %34 = dma.hbm_to_vmem [thread:$0]  %s27_s19, 128, %s29_s21, [#allocation6], %s257_s22, %s257_s22, %s258_s23  }
   0x9   :  { %38 = vsyncadd [#allocation6], 128  ;;  %s39_s25 = sshll.u32 %s295_s2, 4  ;;  %s259_s26 = smov [#allocation7]   ;;  %s40_s25 = int_to_ptr.hbm [resolvable:$true] %s39_s25 }
   0xa   :  { %s41_s27 = sshll.u32 %s259_s26, 4  ;;  %s42_s27 = int_to_ptr.vmem [resolvable:$true] %s41_s27 }
   0xb   :  { %47 = dma.hbm_to_vmem [thread:$0]  %s40_s25, 128, %s42_s27, [#allocation6], %s257_s22, %s257_s22, %s258_s23  }
   0xc   :  { %249 = dma.done.wait [#allocation3], 32  }
   0xd   :  { %250 = vsyncadd [#allocation3], 4294967264 }
   0xe   :  { %251 = dma.done.wait [#allocation6], 512  }
   0xf   :  { %252 = vsyncadd [#allocation6], 4294966784  ;;  %v60_v0 = vld [vmem:[#allocation5] sm:$0xff]  ;;  %v98_v1 = vld [vmem:[#allocation2] sm:$0x3]  ;;  %vm107_vm0 = vcmask 57344  }
  0x10   :  { %v73_v2 = vadd.f32 1e-08, %v60_v0  ;;  %v100_v3 = vrot.slane %v98_v1, 7  ;;  %v62_v6 = vld [vmem:[#allocation7] sm:$0xff]  ;;  %s260_s2 = smov [#allocation8]   ;;  %s130_s5 = sshll.u32 %s296_s3, 4  ;;  %s131_s5 = int_to_ptr.hbm [resolvable:$true] %s130_s5 }
  0x11   :  { %s128_s28 = sshll.u32 %s260_s2, 4  ;;  %s129_s28 = int_to_ptr.vmem [resolvable:$true] %s128_s28 }
  0x12   :  { %151 = vlog2.f32 %v73_v2  ;;  %v102_v4 = vsub.f32 %v98_v1, %v100_v3 }
  0x14   :  { %v103_v8 = vmul.f32 %v102_v4, %v102_v4 }
  0x16   :  { %v105_v10 = vrot.slane %v103_v8, 1 }
  0x18   :  { %v152_v5 = vpop.eup %151  ;;  %v108_v11 = vsel %vm107_vm0, %v105_v10, 0.0 }
  0x19   :  { %v76_v7 = vmul.f32 0.6931472, %v152_v5 }
  0x1b   :  { %v79_v9 = vmul.f32 %v76_v7, %v62_v6 }
  0x1d   :  { %88 = vadd.xlane.f32.xlu0 %v79_v9 }
  0x25   :  { %109 = vadd.xlane.f32.xlu0 %v108_v11 }
  0x90   :  { %v89_v12 = vpop.xlane.xlu0 %88 }
  0x91   :  { %v90_v13 = vrot.slane %v89_v12, 4 }
  0x93   :  { %v91_v14 = vadd.f32 %v90_v13, %v89_v12 }
  0x95   :  { %v92_v15 = vrot.slane %v91_v14, 2 }
  0x97   :  { %v93_v16 = vadd.f32 %v92_v15, %v91_v14 }
  0x98   :  { %v110_v17 = vpop.xlane.xlu0 %109 }
  0x99   :  { %v111_v18 = vrot.slane %v110_v17, 4  ;;  %v94_v19 = vrot.slane %v93_v16, 1 }
  0x9b   :  { %v112_v20 = vadd.f32 %v111_v18, %v110_v17  ;;  %v95_v21 = vadd.f32 %v94_v19, %v93_v16 }
  0x9d   :  { %v113_v22 = vrot.slane %v112_v20, 2  ;;  %141 = vpush %v95_v21 }
  0x9f   :  { %v114_v23 = vadd.f32 %v113_v22, %v112_v20 }
  0xa1   :  { %v115_v24 = vrot.slane %v114_v23, 1 }
  0xa3   :  { %v116_v25 = vadd.f32 %v115_v24, %v114_v23 }
  0xa5   :  { %143 = vpush %v116_v25 }
  0xce   :  { %s142_s1 = spop %141 }
  0xcf   :  { %s97_s29 = ssub.f32 0.0, %s142_s1 }
  0xd6   :  { %s144_s6 = spop %143 }
  0xd7   :  { %s120_s7 = sadd.f32 %s144_s6, %s97_s29 }
  0xd9   :  { %v121_v26 = vstv %s120_s7 }
  0xda   :  { %122 = vst [vmem:[#allocation8] sm:$0xff] %v121_v26 }
  0xdb   :  { %133 = dma.vmem_to_hbm [thread:$0]  %s129_s28, 128, %s131_s5, [#allocation4]  }
  0xdc   :  { %253 = dma.done.wait [#allocation4], 128  }
  0xdd   :  { %254 = vsyncadd [#allocation4], 4294967168 }
  0xde   :  { %138 = vsyncpa [#allocation3], 1 }
  0xdf   :  { %139 = vsyncpa [#allocation6], 1 }
  0xe0   :  { %140 = vsyncpa [#allocation4], 1 }

</bundles_post_ra>
